<compile_context>
chip_gen: v5e
topology: v5e:2x2
jax: 0.10.0
libtpu: 0.0.40
codegen_flags: <defaults>
</compile_context>

<pallas_src>
import math

import jax
import jax.numpy as jnp
from jax.experimental import pallas as pl
from jax.experimental.pallas import tpu as pltpu


def _build_pe(d_model: int, max_len: int = 21) -> jnp.ndarray:
    """Deterministic positional-encoding buffer, identical to the PyTorch __init__.

    Returns pe with shape (max_len, 1, d_model) (after unsqueeze(0).transpose(0,1)).
    """
    position = jnp.arange(0, max_len, dtype=jnp.float32)[:, None]          # (max_len, 1)
    div_term = jnp.exp(
        jnp.arange(0, d_model, 2, dtype=jnp.float32) * (-math.log(10000.0) / d_model)
    )                                                                       # (ceil(d/2),)
    pe = jnp.zeros((max_len, d_model), dtype=jnp.float32)
    pe = pe.at[:, 0::2].set(jnp.sin(position * div_term))
    if d_model % 2 == 0:
        pe = pe.at[:, 1::2].set(jnp.cos(position * div_term))
    else:
        pe = pe.at[:, 1::2].set(jnp.cos(position * div_term[: div_term.shape[0] - 1]))
    return pe[:, None, :]                                                   # (max_len, 1, d_model)


def _add_pe_kernel(x_ref, pe_ref, o_ref):
    # Pure VPU elementwise add on identically shaped, lane-dense (TS, B*D) tiles.
    o_ref[...] = x_ref[...] + pe_ref[...]


def positional_encoding_forward(
    x: jnp.ndarray, pe: jnp.ndarray, *, target_tile_bytes: int = 2 << 20
) -> jnp.ndarray:
    """Computes x + pe[:x.shape[0], :] via a Pallas TPU kernel.

    x:  (S, B, D) float32
    pe: (max_len, 1, D) float32 buffer
    """
    S, B, D = x.shape
    C = B * D

    # Lane-dense 2D layout (free reshape: merges contiguous trailing dims).
    x2d = x.reshape(S, C)
    # Pre-broadcast pe over the batch so the kernel is a plain same-shape add on
    # full-lane tiles. pe2d has at most max_len (=21) rows, so this is tiny.
    pe2d = jnp.tile(pe[:S, 0, :].astype(x.dtype), (1, B))                   # (S, C)

    # Row-tile size: as many sequence rows per grid step as fit a ~2 MiB tile.
    # With max_len=21 this resolves to a single full-array block (grid=(1,)).
    row_bytes = C * jnp.dtype(x.dtype).itemsize
    ts = max(1, target_tile_bytes // max(row_bytes, 1))
    if ts >= S:
        ts = S                        # single block covers the whole array
    else:
        ts = max(8, (ts // 8) * 8)    # keep row tiles sublane-aligned
    grid = (pl.cdiv(S, ts),)

    out2d = pl.pallas_call(
        _add_pe_kernel,
        out_shape=jax.ShapeDtypeStruct((S, C), x.dtype),
        grid_spec=pltpu.PrefetchScalarGridSpec(
            num_scalar_prefetch=0,
            grid=grid,
            in_specs=[
                pl.BlockSpec((ts, C), lambda i: (i, 0)),
                pl.BlockSpec((ts, C), lambda i: (i, 0)),
            ],
            out_specs=pl.BlockSpec((ts, C), lambda i: (i, 0)),
        ),
        compiler_params=pltpu.CompilerParams(
            # Lets the (row-tiled) grid shard across v7x's 2 TensorCores; no-op
            # on single-TC v5e/v6e and when grid == (1,).
            dimension_semantics=("parallel",),
        ),
    )(x2d, pe2d)

    return out2d.reshape(S, B, D)


if __name__ == "__main__":
    # Small shapes consistent with the module: seq=8, batch=2, d_model=32, max_len=21.
    S, B, D = 8, 2, 32
    key = jax.random.PRNGKey(0)
    x = jax.random.normal(key, (S, B, D), dtype=jnp.float32)

    pe = _build_pe(d_model=D, max_len=21)

    out = positional_encoding_forward(x, pe)
    out = jax.block_until_ready(out)

    # Reference check in plain JAX (same semantics as the PyTorch forward).
    ref = x + pe[:S]
    assert out.shape == (S, B, D)
    assert jnp.allclose(out, ref, atol=1e-6), "mismatch vs reference"

    print("KERNEL_OK")
</pallas_src>

<mosaic_0001>
module attributes {stable_mosaic.version = 11 : i64} {
  func.func @_add_pe_kernel(%arg0: i32, %arg1: memref<8x64xf32, #tpu.memory_space<vmem>>, %arg2: memref<8x64xf32, #tpu.memory_space<vmem>>, %arg3: memref<8x64xf32, #tpu.memory_space<vmem>>) attributes {dimension_semantics = [#tpu.dimension_semantics<parallel>], iteration_bounds = array<i64: 1>, scalar_prefetch = 0 : i64, scratch_operands = 0 : i64, tpu.core_type = #tpu.core_type<tc>, window_params = [{transform_indices = @transform_0, window_bounds = array<i64: 8, 64>}, {transform_indices = @transform_1, window_bounds = array<i64: 8, 64>}, {transform_indices = @transform_2, window_bounds = array<i64: 8, 64>}]} {
    %c0 = arith.constant 0 : index
    %c0_0 = arith.constant 0 : index
    %0 = vector.load %arg1[%c0, %c0_0] : memref<8x64xf32, #tpu.memory_space<vmem>>, vector<8x64xf32>
    %c0_1 = arith.constant 0 : index
    %c0_2 = arith.constant 0 : index
    %1 = vector.load %arg2[%c0_1, %c0_2] : memref<8x64xf32, #tpu.memory_space<vmem>>, vector<8x64xf32>
    %2 = arith.addf %0, %1 : vector<8x64xf32>
    %c0_3 = arith.constant 0 : index
    %c0_4 = arith.constant 0 : index
    %3 = vector.load %arg3[%c0_3, %c0_4] : memref<8x64xf32, #tpu.memory_space<vmem>>, vector<8x64xf32>
    tpu.vector_store %arg3[%c0_3, %c0_4], %2 {strides = array<i32>} : memref<8x64xf32, #tpu.memory_space<vmem>>, vector<8x64xf32>,
    return
  }
  func.func @transform_0(%arg0: i32) -> (i32, i32) {
    %c0_i32 = arith.constant 0 : i32
    %c0_i32_0 = arith.constant 0 : i32
    return %arg0, %c0_i32 : i32, i32
  }
  func.func @transform_1(%arg0: i32) -> (i32, i32) {
    %c0_i32 = arith.constant 0 : i32
    %c0_i32_0 = arith.constant 0 : i32
    return %arg0, %c0_i32 : i32, i32
  }
  func.func @transform_2(%arg0: i32) -> (i32, i32) {
    %c0_i32 = arith.constant 0 : i32
    %c0_i32_0 = arith.constant 0 : i32
    return %arg0, %c0_i32 : i32, i32
  }
}

</mosaic_0001>

<bundles_post_ra>
// kernel: tpu_custom_call.1
= control target key start
LH: loop header
LB: loop body
LE: loop exit
PB: predicated region body
PF: predicated region fallthrough
CT: control target
= control target key end

     0   :  { %7 = vsyncpa [#allocation3], 0  ;;  %s171_s0 = inlined_call_operand.hbm [shape: f32[8,64], index: 0, kind: input, shape index: {}]   ;;  %s172_s1 = inlined_call_operand.hbm [shape: f32[8,64], index: 1, kind: input, shape index: {}]   ;;  %s173_s2 = inlined_call_operand.hbm [shape: f32[8,64], index: 2, kind: output, shape index: {}]  }
   0x1   :  { %8 = vsyncpa [#allocation6], 0 }
   0x2   :  { %9 = vsyncpa [#allocation4], 0  ;;  %s15_s11 = sshll.u32 %s171_s0, 4  ;;  %s144_s12 = smov [#allocation2]   ;;  %s16_s11 = int_to_ptr.hbm [resolvable:$true] %s15_s11 }
   0x3   :  { %s17_s13 = sshll.u32 %s144_s12, 4  ;;  %s26_s16 = sshll.u32 %s172_s1, 4  ;;  %s18_s13 = int_to_ptr.vmem [resolvable:$true] %s17_s13  ;;  %s27_s16 = int_to_ptr.hbm [resolvable:$true] %s26_s16 }
   0x4   :  { %20 = dma.hbm_to_vmem [thread:$0]  %s16_s11, 128, %s18_s13, [#allocation3]  }
   0x5   :  { %s145_s17 = smov [#allocation5]  }
   0x6   :  { %s28_s18 = sshll.u32 %s145_s17, 4  ;;  %s29_s18 = int_to_ptr.vmem [resolvable:$true] %s28_s18 }
   0x7   :  { %31 = dma.hbm_to_vmem [thread:$0]  %s27_s16, 128, %s29_s18, [#allocation6]  }
   0x8   :  { %138 = dma.done.wait [#allocation3], 128  }
   0x9   :  { %139 = vsyncadd [#allocation3], 4294967168 }
   0xa   :  { %140 = dma.done.wait [#allocation6], 128  }
   0xb   :  { %141 = vsyncadd [#allocation6], 4294967168  ;;  %s146_s19 = smov [#allocation7]   ;;  %s52_s22 = sshll.u32 %s173_s2, 4  ;;  %v40_v0 = vld [vmem:[#allocation2] sm:$0xff]  ;;  %v41_v1 = vld [vmem:[#allocation5] sm:$0xff]  ;;  %s53_s22 = int_to_ptr.hbm [resolvable:$true] %s52_s22 }
   0xc   :  { %s50_s0 = sshll.u32 %s146_s19, 4  ;;  %vm43_vm0 = vcmask 523264   ;;  %v42_v2 = vadd.f32 %v41_v1, %v40_v0  ;;  %s51_s0 = int_to_ptr.vmem [resolvable:$true] %s50_s0 }
   0xe   :  { %44 = vst.msk [vmem:[#allocation7] sm:$0xff] %vm43_vm0, %v42_v2 }
   0xf   :  { %55 = dma.vmem_to_hbm [thread:$0]  %s51_s0, 128, %s53_s22, [#allocation4]  }
  0x10   :  { %142 = dma.done.wait [#allocation4], 128  }
  0x11   :  { %143 = vsyncadd [#allocation4], 4294967168 }
  0x12   :  { %60 = vsyncpa [#allocation3], 1 }
  0x13   :  { %61 = vsyncpa [#allocation6], 1 }
  0x14   :  { %62 = vsyncpa [#allocation4], 1 }

</bundles_post_ra>
